<compile_context>
chip_gen: v5e
topology: v5e:2x2
jax: 0.10.0
libtpu: 0.0.40
codegen_flags: <defaults>
</compile_context>

<pallas_src>
import functools

import jax
import jax.numpy as jnp
from jax.experimental import pallas as pl
from jax.experimental.pallas import tpu as pltpu

# ---- module hyper-parameters (mirrors rtRouter.__init__) --------------------
IN_PLANES = 32          # in_planes
OPTION = 3              # option == 3 (asserted in the module)
FEA_DIM = 256           # self.fea_dim
BN_EPS = 1e-5           # nn.BatchNorm1d default eps
HW_TILE_MAX = 8192      # max lanes per grid step for the pooling reduction


def _router_kernel(inv_hw, hw_rem,
                   x_ref,      # (N, C, hw_tile)  current spatial tile
                   w0_ref,     # (C, C)           layer0 weight, BN folded in
                   w1g_ref,    # (C, FEA_DIM)     fused layer1 @ Wg
                   w2_ref,     # (FEA_DIM, OPTION)
                   bias_ref,   # (3+N, FEA_DIM)   packed [b0 | b1g | b2 | gumbel]
                   out_ref,    # (N, OPTION)
                   pool_acc):  # VMEM scratch (N, C) f32
    step = pl.program_id(0)
    last = pl.num_programs(0) - 1

    @pl.when(step == 0)
    def _():
        pool_acc[...] = jnp.zeros_like(pool_acc)

    # Partial sum of the global average pool over this HW tile.  Accumulation
    # across grid steps overlaps with the next tile's DMA.
    if hw_rem:
        # Ragged last tile: Pallas does NOT zero out-of-bounds block lanes, so
        # mask lanes >= hw_rem before summing (only on the last step).
        @pl.when(step == last)
        def _():
            lane = jax.lax.broadcasted_iota(jnp.int32, x_ref.shape, 2)
            xm = jnp.where(lane < hw_rem, x_ref[...], 0.0)
            pool_acc[...] += jnp.sum(xm, axis=-1)

        @pl.when(step != last)
        def _():
            pool_acc[...] += jnp.sum(x_ref[...], axis=-1)
    else:
        pool_acc[...] += jnp.sum(x_ref[...], axis=-1)

    @pl.when(step == last)
    def _():
        # F.avg_pool2d(x, H) + view: sum / (H*W).
        pooled = pool_acc[...] * inv_hw                          # (N, C)

        b0 = bias_ref[0:1, :IN_PLANES]                           # (1, C)
        b1g = bias_ref[1:2, :]                                   # (1, FEA_DIM)
        b2 = bias_ref[2:3, :OPTION]                              # (1, OPTION)
        gum = bias_ref[3:, :OPTION]                              # (N, OPTION)

        # layer0 (Linear C->C) with BatchNorm1d(eval) pre-folded, then ReLU.
        h = jnp.dot(pooled, w0_ref[...],
                    preferred_element_type=jnp.float32) + b0
        h = jnp.maximum(h, 0.0)                                  # (N, C)

        # layer1 fused into the LayerGraph GCN projection (no nonlinearity
        # between them): relu((h@w1 + b1)@wg + bg) == relu(h@(w1@wg) + b1g).
        # TODO(synk): LayerGraph source not provided; prev/pprev == None path
        # (single-node graph conv) is what is implemented here.
        gcn = jnp.dot(h, w1g_ref[...],
                      preferred_element_type=jnp.float32) + b1g
        gcn = jnp.maximum(gcn, 0.0)                              # (N, FEA_DIM)

        # layer2 (Linear fea_dim->option); dropout(p=0.4, training=False) = id.
        ln = jnp.dot(gcn, w2_ref[...],
                     preferred_element_type=jnp.float32) + b2    # (N, OPTION)

        # F.gumbel_softmax(ln, tau=1, hard=False): softmax(ln + gumbel).
        # Exact divide (one-shot on (N,3)) so probabilities sum to 1 exactly.
        z = ln + gum
        z = z - jnp.max(z, axis=-1, keepdims=True)
        e = jnp.exp(z)
        out_ref[...] = e / jnp.sum(e, axis=-1, keepdims=True)


def fuse_params(params):
    """One-time algebraic fusion of the module parameters (eval mode).

    Call this once whenever weights change; the per-call forward only sees
    the fused operands (no rsqrt / small dots / scatters in the hot path).
    """
    (w0, b0, gamma, beta, mu, var, w1, b1, wg, bg, w2, b2) = params

    scale = gamma * jax.lax.rsqrt(var + BN_EPS)            # (1, C)
    w0f = w0 * scale                                       # BN folded into W0
    b0f = (b0 - mu) * scale + beta                         # BN folded into b0
    w1g = jnp.dot(w1, wg)                                  # (C, FEA_DIM)
    b1g = jnp.dot(b1, wg) + bg                             # (1, FEA_DIM)

    # Pack the static biases into a single lane-padded slab (rows 0..2);
    # per-call gumbel noise is appended as rows 3..3+N in the forward.
    bias_base = jnp.zeros((3, FEA_DIM), jnp.float32)
    bias_base = bias_base.at[0:1, :IN_PLANES].set(b0f)
    bias_base = bias_base.at[1:2, :].set(b1g)
    bias_base = bias_base.at[2:3, :OPTION].set(b2)

    return w0f, w1g, w2, bias_base


@jax.jit
def rt_router_forward(x, fused_params, gumbel_noise):
    """x: (N, C, H, W) float32 (NCHW).  Returns (probs, probs) like the module."""
    n, c, h, w = x.shape
    # F.avg_pool2d(x, x.size(2)) uses an HxH kernel; only equivalent to a full
    # global mean when the spatial dims are square.
    assert h == w, "rtRouter pooling assumes square spatial input (H == W)"
    hw = h * w

    w0f, w1g, w2, bias_base = fused_params

    # Fold the per-call gumbel noise into the bias slab -> one fewer DMA.
    gum_rows = jnp.zeros((n, FEA_DIM), jnp.float32).at[:, :OPTION].set(gumbel_noise)
    bias_slab = jnp.concatenate([bias_base, gum_rows], axis=0)   # (3+N, FEA_DIM)

    # ---- spatial tiling for the pool (grid over H*W, reduction axis) --------
    # No jnp.pad: the ragged final tile is masked inside the kernel.
    hw_tile = min(HW_TILE_MAX, pl.cdiv(hw, 128) * 128)
    n_steps = pl.cdiv(hw, hw_tile)
    hw_rem = hw % hw_tile                      # 0 -> all tiles full, no mask
    x_flat = x.reshape(n, c, hw)

    kernel = functools.partial(_router_kernel, 1.0 / float(hw), hw_rem)

    out = pl.pallas_call(
        kernel,
        out_shape=jax.ShapeDtypeStruct((n, OPTION), jnp.float32),
        grid_spec=pltpu.PrefetchScalarGridSpec(
            num_scalar_prefetch=0,
            grid=(n_steps,),
            in_specs=[
                pl.BlockSpec((n, c, hw_tile), lambda s: (0, 0, s)),
                pl.BlockSpec((c, c), lambda s: (0, 0)),
                pl.BlockSpec((c, FEA_DIM), lambda s: (0, 0)),
                pl.BlockSpec((FEA_DIM, OPTION), lambda s: (0, 0)),
                pl.BlockSpec((3 + n, FEA_DIM), lambda s: (0, 0)),
            ],
            out_specs=pl.BlockSpec((n, OPTION), lambda s: (0, 0)),
            scratch_shapes=[pltpu.VMEM((n, c), jnp.float32)],
        ),
        compiler_params=pltpu.CompilerParams(
            dimension_semantics=("arbitrary",),
            vmem_limit_bytes=32 * 1024 * 1024,
        ),
    )(x_flat, w0f, w1g, w2, bias_slab)
    return out, out


def init_params(key):
    """Deterministic parameter init (PyTorch Linear-style uniform bounds).

    Linear weights are stored pre-transposed to (in, out) so the kernel can do
    row-major `x @ W`.
    """
    ks = jax.random.split(key, 8)

    def linear(kw, kb, fan_in, fan_out):
        bound = 1.0 / jnp.sqrt(fan_in)
        w = jax.random.uniform(kw, (fan_in, fan_out), jnp.float32, -bound, bound)
        b = jax.random.uniform(kb, (1, fan_out), jnp.float32, -bound, bound)
        return w, b

    w0, b0 = linear(ks[0], ks[1], IN_PLANES, IN_PLANES)          # layer0
    w1, b1 = linear(ks[2], ks[3], IN_PLANES, OPTION)             # layer1
    wg, bg = linear(ks[4], ks[5], OPTION, FEA_DIM)               # LayerGraph
    w2, b2 = linear(ks[6], ks[7], FEA_DIM, OPTION)               # layer2

    # BatchNorm1d(C) fresh init: gamma=1, beta=0, running_mean=0, running_var=1.
    gamma = jnp.ones((1, IN_PLANES), jnp.float32)
    beta = jnp.zeros((1, IN_PLANES), jnp.float32)
    run_mean = jnp.zeros((1, IN_PLANES), jnp.float32)
    run_var = jnp.ones((1, IN_PLANES), jnp.float32)

    return (w0, b0, gamma, beta, run_mean, run_var,
            w1, b1, wg, bg, w2, b2)


def reference_forward(x, params, gumbel_noise):
    """Pure-JAX reference of the same eval-mode forward pass (unfused math)."""
    (w0, b0, gamma, beta, mu, var, w1, b1, wg, bg, w2, b2) = params
    pooled = jnp.mean(x.reshape(x.shape[0], x.shape[1], -1), axis=-1)
    h = pooled @ w0 + b0
    h = (h - mu) / jnp.sqrt(var + BN_EPS) * gamma + beta
    h = jnp.maximum(h, 0.0)
    logits = h @ w1 + b1
    gcn = jnp.maximum(logits @ wg + bg, 0.0)
    ln = gcn @ w2 + b2
    return jax.nn.softmax(ln + gumbel_noise, axis=-1)


if __name__ == "__main__":
    key = jax.random.PRNGKey(0)
    k_param, k_x, k_gum = jax.random.split(key, 3)

    N, C, H, W = 2, IN_PLANES, 16, 16
    x = jax.random.normal(k_x, (N, C, H, W), jnp.float32)

    params = init_params(k_param)
    fused_params = jax.tree.map(jax.block_until_ready, fuse_params(params))

    # Gumbel noise for F.gumbel_softmax (tau=1, hard=False): -log(-log(U)).
    u = jax.random.uniform(k_gum, (N, OPTION), jnp.float32,
                           minval=1e-10, maxval=1.0)
    gumbel_noise = -jnp.log(-jnp.log(u))

    probs_a, probs_b = rt_router_forward(x, fused_params, gumbel_noise)
    probs_a = jax.block_until_ready(probs_a)

    ref = reference_forward(x, params, gumbel_noise)
    assert probs_a.shape == (N, OPTION)
    assert jnp.allclose(probs_a, ref, atol=1e-4, rtol=1e-4), "mismatch vs reference"
    assert jnp.allclose(jnp.sum(probs_a, axis=-1), 1.0, atol=1e-5)

    print("KERNEL_OK")
</pallas_src>

<mosaic_0001>
module attributes {stable_mosaic.version = 11 : i64} {
  func.func @_router_kernel(%arg0: i32, %arg1: memref<2x32x256xf32, #tpu.memory_space<vmem>>, %arg2: memref<32x32xf32, #tpu.memory_space<vmem>>, %arg3: memref<32x256xf32, #tpu.memory_space<vmem>>, %arg4: memref<256x3xf32, #tpu.memory_space<vmem>>, %arg5: memref<5x256xf32, #tpu.memory_space<vmem>>, %arg6: memref<2x3xf32, #tpu.memory_space<vmem>>, %arg7: memref<2x32xf32, #tpu.memory_space<vmem>>) attributes {dimension_semantics = [#tpu.dimension_semantics<arbitrary>], iteration_bounds = array<i64: 1>, scalar_prefetch = 0 : i64, scratch_operands = 1 : i64, tpu.core_type = #tpu.core_type<tc>, window_params = [{transform_indices = @transform_0, window_bounds = array<i64: 2, 32, 256>}, {pipeline_mode = #tpu.pipeline_mode<synchronous>, transform_indices = @transform_1, window_bounds = array<i64: 32, 32>}, {pipeline_mode = #tpu.pipeline_mode<synchronous>, transform_indices = @transform_2, window_bounds = array<i64: 32, 256>}, {pipeline_mode = #tpu.pipeline_mode<synchronous>, transform_indices = @transform_3, window_bounds = array<i64: 256, 3>}, {pipeline_mode = #tpu.pipeline_mode<synchronous>, transform_indices = @transform_4, window_bounds = array<i64: 5, 256>}, {pipeline_mode = #tpu.pipeline_mode<synchronous>, transform_indices = @transform_5, window_bounds = array<i64: 2, 3>}]} {
    %c0_i32 = arith.constant 0 : i32
    %0 = arith.cmpi eq, %arg0, %c0_i32 : i32
    %1 = arith.extui %0 : i1 to i32
    %c0_i32_0 = arith.constant 0 : i32
    %2 = arith.cmpi ne, %1, %c0_i32_0 : i32
    scf.if %2 {
      %cst_9 = arith.constant 0.000000e+00 : f32
      %11 = vector.broadcast %cst_9 : f32 to vector<2x32xf32>
      %c0_10 = arith.constant 0 : index
      %c0_11 = arith.constant 0 : index
      %12 = vector.load %arg7[%c0_10, %c0_11] : memref<2x32xf32, #tpu.memory_space<vmem>>, vector<2x32xf32>
      tpu.vector_store %arg7[%c0_10, %c0_11], %11 {strides = array<i32>} : memref<2x32xf32, #tpu.memory_space<vmem>>, vector<2x32xf32>,
    } else {
    }
    %c0 = arith.constant 0 : index
    %c0_1 = arith.constant 0 : index
    %3 = vector.load %arg7[%c0, %c0_1] : memref<2x32xf32, #tpu.memory_space<vmem>>, vector<2x32xf32>
    %c0_2 = arith.constant 0 : index
    %c0_3 = arith.constant 0 : index
    %c0_4 = arith.constant 0 : index
    %4 = vector.load %arg1[%c0_2, %c0_3, %c0_4] : memref<2x32x256xf32, #tpu.memory_space<vmem>>, vector<2x32x256xf32>
    %cst = arith.constant dense<0.000000e+00> : vector<2x32xf32>
    %5 = vector.multi_reduction <add>, %4, %cst [2] : vector<2x32x256xf32> to vector<2x32xf32>
    %6 = arith.addf %3, %5 : vector<2x32xf32>
    %c0_5 = arith.constant 0 : index
    %c0_6 = arith.constant 0 : index
    %7 = vector.load %arg7[%c0_5, %c0_6] : memref<2x32xf32, #tpu.memory_space<vmem>>, vector<2x32xf32>
    tpu.vector_store %arg7[%c0_5, %c0_6], %6 {strides = array<i32>} : memref<2x32xf32, #tpu.memory_space<vmem>>, vector<2x32xf32>,
    %c0_i32_7 = arith.constant 0 : i32
    %8 = arith.cmpi eq, %arg0, %c0_i32_7 : i32
    %9 = arith.extui %8 : i1 to i32
    %c0_i32_8 = arith.constant 0 : i32
    %10 = arith.cmpi ne, %9, %c0_i32_8 : i32
    scf.if %10 {
      %c0_9 = arith.constant 0 : index
      %c0_10 = arith.constant 0 : index
      %11 = vector.load %arg7[%c0_9, %c0_10] : memref<2x32xf32, #tpu.memory_space<vmem>>, vector<2x32xf32>
      %cst_11 = arith.constant 3.906250e-03 : f32
      %12 = vector.broadcast %cst_11 : f32 to vector<2x32xf32>
      %13 = arith.mulf %11, %12 : vector<2x32xf32>
      %c0_12 = arith.constant 0 : index
      %c0_13 = arith.constant 0 : index
      %14 = vector.load %arg5[%c0_12, %c0_13] : memref<5x256xf32, #tpu.memory_space<vmem>>, vector<1x32xf32>
      %c1 = arith.constant 1 : index
      %c0_14 = arith.constant 0 : index
      %15 = vector.load %arg5[%c1, %c0_14] : memref<5x256xf32, #tpu.memory_space<vmem>>, vector<1x256xf32>
      %c2 = arith.constant 2 : index
      %c0_15 = arith.constant 0 : index
      %16 = vector.load %arg5[%c2, %c0_15] : memref<5x256xf32, #tpu.memory_space<vmem>>, vector<1x3xf32>
      %c3 = arith.constant 3 : index
      %c0_16 = arith.constant 0 : index
      %17 = vector.load %arg5[%c3, %c0_16] : memref<5x256xf32, #tpu.memory_space<vmem>>, vector<2x3xf32>
      %c0_17 = arith.constant 0 : index
      %c0_18 = arith.constant 0 : index
      %18 = vector.load %arg2[%c0_17, %c0_18] : memref<32x32xf32, #tpu.memory_space<vmem>>, vector<32x32xf32>
      %cst_19 = arith.constant dense<0.000000e+00> : vector<2x32xf32>
      %19 = tpu.matmul %13, %18, %cst_19 {dimension_numbers = #tpu.dot_dimension_numbers<[1], [0], [0], [1], [0, 0, 1, 1], [], []>} : vector<2x32xf32>, vector<32x32xf32>, vector<2x32xf32> -> vector<2x32xf32>
      %20 = vector.broadcast %14 : vector<1x32xf32> to vector<2x32xf32>
      %21 = arith.addf %19, %20 : vector<2x32xf32>
      %cst_20 = arith.constant 0.000000e+00 : f32
      %22 = vector.broadcast %cst_20 : f32 to vector<2x32xf32>
      %23 = arith.maximumf %21, %22 : vector<2x32xf32>
      %c0_21 = arith.constant 0 : index
      %c0_22 = arith.constant 0 : index
      %24 = vector.load %arg3[%c0_21, %c0_22] : memref<32x256xf32, #tpu.memory_space<vmem>>, vector<32x256xf32>
      %cst_23 = arith.constant dense<0.000000e+00> : vector<2x256xf32>
      %25 = tpu.matmul %23, %24, %cst_23 {dimension_numbers = #tpu.dot_dimension_numbers<[1], [0], [0], [1], [0, 0, 1, 1], [], []>} : vector<2x32xf32>, vector<32x256xf32>, vector<2x256xf32> -> vector<2x256xf32>
      %26 = vector.broadcast %15 : vector<1x256xf32> to vector<2x256xf32>
      %27 = arith.addf %25, %26 : vector<2x256xf32>
      %cst_24 = arith.constant 0.000000e+00 : f32
      %28 = vector.broadcast %cst_24 : f32 to vector<2x256xf32>
      %29 = arith.maximumf %27, %28 : vector<2x256xf32>
      %c0_25 = arith.constant 0 : index
      %c0_26 = arith.constant 0 : index
      %30 = vector.load %arg4[%c0_25, %c0_26] : memref<256x3xf32, #tpu.memory_space<vmem>>, vector<256x3xf32>
      %cst_27 = arith.constant dense<0.000000e+00> : vector<2x3xf32>
      %31 = tpu.matmul %29, %30, %cst_27 {dimension_numbers = #tpu.dot_dimension_numbers<[1], [0], [0], [1], [0, 0, 1, 1], [], []>} : vector<2x256xf32>, vector<256x3xf32>, vector<2x3xf32> -> vector<2x3xf32>
      %32 = vector.broadcast %16 : vector<1x3xf32> to vector<2x3xf32>
      %33 = arith.addf %31, %32 : vector<2x3xf32>
      %34 = arith.addf %33, %17 : vector<2x3xf32>
      %cst_28 = arith.constant dense<0xFF800000> : vector<2xf32>
      %35 = vector.multi_reduction <maximumf>, %34, %cst_28 [1] : vector<2x3xf32> to vector<2xf32>
      %36 = vector.shape_cast %35 : vector<2xf32> to vector<2x1xf32>
      %37 = vector.broadcast %36 : vector<2x1xf32> to vector<2x3xf32>
      %38 = arith.subf %34, %37 : vector<2x3xf32>
      %39 = math.exp %38 : vector<2x3xf32>
      %cst_29 = arith.constant dense<0.000000e+00> : vector<2xf32>
      %40 = vector.multi_reduction <add>, %39, %cst_29 [1] : vector<2x3xf32> to vector<2xf32>
      %41 = vector.shape_cast %40 : vector<2xf32> to vector<2x1xf32>
      %42 = vector.broadcast %41 : vector<2x1xf32> to vector<2x3xf32>
      %43 = arith.divf %39, %42 : vector<2x3xf32>
      %c0_30 = arith.constant 0 : index
      %c0_31 = arith.constant 0 : index
      %44 = vector.load %arg6[%c0_30, %c0_31] : memref<2x3xf32, #tpu.memory_space<vmem>>, vector<2x3xf32>
      tpu.vector_store %arg6[%c0_30, %c0_31], %43 {strides = array<i32>} : memref<2x3xf32, #tpu.memory_space<vmem>>, vector<2x3xf32>,
    } else {
    }
    return
  }
  func.func @transform_0(%arg0: i32) -> (i32, i32, i32) {
    %c0_i32 = arith.constant 0 : i32
    %c0_i32_0 = arith.constant 0 : i32
    %c0_i32_1 = arith.constant 0 : i32
    return %c0_i32, %c0_i32_0, %arg0 : i32, i32, i32
  }
  func.func @transform_1(%arg0: i32) -> (i32, i32) {
    %c0_i32 = arith.constant 0 : i32
    %c0_i32_0 = arith.constant 0 : i32
    %c0_i32_1 = arith.constant 0 : i32
    return %c0_i32, %c0_i32_0 : i32, i32
  }
  func.func @transform_2(%arg0: i32) -> (i32, i32) {
    %c0_i32 = arith.constant 0 : i32
    %c0_i32_0 = arith.constant 0 : i32
    %c0_i32_1 = arith.constant 0 : i32
    return %c0_i32, %c0_i32_0 : i32, i32
  }
  func.func @transform_3(%arg0: i32) -> (i32, i32) {
    %c0_i32 = arith.constant 0 : i32
    %c0_i32_0 = arith.constant 0 : i32
    %c0_i32_1 = arith.constant 0 : i32
    return %c0_i32, %c0_i32_0 : i32, i32
  }
  func.func @transform_4(%arg0: i32) -> (i32, i32) {
    %c0_i32 = arith.constant 0 : i32
    %c0_i32_0 = arith.constant 0 : i32
    %c0_i32_1 = arith.constant 0 : i32
    return %c0_i32, %c0_i32_0 : i32, i32
  }
  func.func @transform_5(%arg0: i32) -> (i32, i32) {
    %c0_i32 = arith.constant 0 : i32
    %c0_i32_0 = arith.constant 0 : i32
    %c0_i32_1 = arith.constant 0 : i32
    return %c0_i32, %c0_i32_0 : i32, i32
  }
}

</mosaic_0001>

<bundles_post_ra>
// kernel: rt_router_forward.1
= control target key start
LH: loop header
LB: loop body
LE: loop exit
PB: predicated region body
PF: predicated region fallthrough
CT: control target
= control target key end

     0   :  { %vm24_vm0 = vcmask 254976   ;;  %v315_v24 = vmov 0.0   ;;  %v75_v30 = vlaneseq  ;;  %vm80_vm1 = vcmask 130112   ;;  %s549_s0 = inlined_call_operand.vmem [shape: f32[2,32,256], index: 0, kind: input, shape index: {}]   ;;  %s550_s1 = inlined_call_operand.vmem [shape: f32[32,32], index: 1, kind: input, shape index: {}]   ;;  %s551_s2 = inlined_call_operand.vmem [shape: f32[32,256], index: 2, kind: input, shape index: {}]   ;;  %s552_s3 = inlined_call_operand.vmem [shape: f32[256,3], index: 3, kind: input, shape index: {}]   ;;  %s553_s4 = inlined_call_operand.vmem [shape: f32[5,256], index: 4, kind: input, shape index: {}]   ;;  %s554_s5 = inlined_call_operand.vmem [shape: f32[2,3], index: 5, kind: output, shape index: {}]  }
   0x1   :  { %v35_v0 = vld [vmem:[%s549_s0 + $0x40] sm:$0xff]  ;;  %v36_v1 = vld [vmem:[%s549_s0 + $0x48] sm:$0xff]  ;;  %v37_v9 = vld [vmem:[%s549_s0 + $0x50] sm:$0xff]  ;;  %25 = vst.msk [vmem:[#allocation2] sm:$0x3] %vm24_vm0, %v315_v24  ;;  %vm84_vm2 = vcmask 195712  }
   0x2   :  { %v27_v2 = vld [vmem:[%s549_s0] sm:$0xff]  ;;  %v55_v3 = vadd.f32 %v36_v1, %v35_v0  ;;  %v28_v4 = vld [vmem:[%s549_s0 + $0x8] sm:$0xff]  ;;  %v38_v10 = vld [vmem:[%s549_s0 + $0x58] sm:$0xff]  ;;  %v76_v36 = vand.u32 127, %v75_v30  ;;  %vm88_vm3 = vcmask 261312   ;;  %vm97_vm4 = vcmask 1041409  }
   0x3   :  { %v31_v5 = vld [vmem:[%s549_s0 + $0x20] sm:$0xff]  ;;  %v32_v6 = vld [vmem:[%s549_s0 + $0x28] sm:$0xff]  ;;  %v43_v7 = vadd.f32 %v28_v4, %v27_v2  ;;  %v29_v11 = vld [vmem:[%s549_s0 + $0x10] sm:$0xff]  ;;  %v58_v15 = vadd.f32 %v38_v10, %v37_v9  ;;  %vm117_vm5 = vcmask 261120   ;;  %vm276_vm6 = vcmask 17408  }
   0x4   :  { %v49_v8 = vadd.f32 %v32_v6, %v31_v5  ;;  %56 = vadd.xlane.f32.xlu1 %v55_v3  ;;  %v30_v12 = vld [vmem:[%s549_s0 + $0x18] sm:$0xff]  ;;  %v39_v13 = vld [vmem:[%s549_s0 + $0x60] sm:$0xff]  ;;  %v40_v14 = vld [vmem:[%s549_s0 + $0x68] sm:$0xff]  ;;  %v78_v37 = vadd.s32 4294967288, %v76_v36  ;;  %v82_v42 = vadd.s32 4294967280, %v76_v36  ;;  %v86_v45 = vadd.s32 4294967272, %v76_v36 }
   0x5   :  { %44 = vadd.xlane.f32.xlu0 %v43_v7  ;;  %v46_v16 = vadd.f32 %v30_v12, %v29_v11  ;;  %v61_v17 = vadd.f32 %v40_v14, %v39_v13  ;;  %v41_v18 = vld [vmem:[%s549_s0 + $0x70] sm:$0xff]  ;;  %v42_v19 = vld [vmem:[%s549_s0 + $0x78] sm:$0xff]  ;;  %v114_v27 = vld [vmem:[%s550_s1 + $0x8] sm:$0xff] }
   0x6   :  { %50 = vadd.xlane.f32.xlu2 %v49_v8  ;;  %v33_v20 = vld [vmem:[%s549_s0 + $0x30] sm:$0xff]  ;;  %v34_v21 = vld [vmem:[%s549_s0 + $0x38] sm:$0xff]  ;;  %v64_v22 = vadd.f32 %v42_v19, %v41_v18  ;;  %v113_v28 = vld [vmem:[%s550_s1] sm:$0xff] }
   0x7   :  { %v52_v23 = vadd.f32 %v34_v21, %v33_v20  ;;  %v116_v25 = vld [vmem:[%s550_s1 + $0x18] sm:$0xff]  ;;  %v115_v26 = vld [vmem:[%s550_s1 + $0x10] sm:$0xff]  ;;  %v146_v35 = vld [vmem:[%s551_s2 + $0x20] sm:$0xff] }
   0x8   :  { %133 = vmatpush.msra.mxu1 %v116_v25  ;;  %v148_v33 = vld [vmem:[%s551_s2 + $0x30] sm:$0xff]  ;;  %v149_v34 = vld [vmem:[%s551_s2 + $0x38] sm:$0xff]  ;;  %v26_v57 = vld [vmem:[#allocation2] sm:$0x3] }
   0x9   :  { %190 = vmatpush.msra.mxu2 %v149_v34  ;;  %v147_v0 = vld [vmem:[%s551_s2 + $0x28] sm:$0xff]  ;;  %v144_v1 = vld [vmem:[%s551_s2 + $0x10] sm:$0xff]  ;;  %v145_v2 = vld [vmem:[%s551_s2 + $0x18] sm:$0xff] }
   0xa   :  { %134 = vmatpush.msra.mxu1 %v115_v26  ;;  %v142_v3 = vld [vmem:[%s551_s2] sm:$0xff]  ;;  %v143_v4 = vld [vmem:[%s551_s2 + $0x8] sm:$0xff]  ;;  %v215_v5 = vld [vmem:[%s552_s3 + $0x78] sm:$0xff] }
   0xb   :  { %191 = vmatpush.msra.mxu2 %v147_v0  ;;  %v214_v6 = vld [vmem:[%s552_s3 + $0x70] sm:$0xff]  ;;  %232 = vmatpush.msra.mxu3 %v215_v5  ;;  %v231_v7 = vld [vmem:[%s552_s3 + $0xf8] sm:$0xff]  ;;  %v213_v8 = vld [vmem:[%s552_s3 + $0x68] sm:$0xff] }
   0xc   :  { %59 = vadd.xlane.f32.xlu1 %v58_v15  ;;  %135 = vmatpush.msra.mxu1 %v114_v27  ;;  %v230_v9 = vld [vmem:[%s552_s3 + $0xf0] sm:$0xff]  ;;  %v229_v10 = vld [vmem:[%s552_s3 + $0xe8] sm:$0xff]  ;;  %v212_v11 = vld [vmem:[%s552_s3 + $0x60] sm:$0xff] }
   0xd   :  { %47 = vadd.xlane.f32.xlu0 %v46_v16  ;;  %192 = vmatpush.msra.mxu2 %v145_v2  ;;  %v228_v12 = vld [vmem:[%s552_s3 + $0xe0] sm:$0xff]  ;;  %v211_v13 = vld [vmem:[%s552_s3 + $0x58] sm:$0xff]  ;;  %v210_v15 = vld [vmem:[%s552_s3 + $0x50] sm:$0xff] }
   0xe   :  { %62 = vadd.xlane.f32.xlu2 %v61_v17  ;;  %136 = vmatpush.msra.mxu1 %v113_v28  ;;  %v227_v14 = vld [vmem:[%s552_s3 + $0xd8] sm:$0xff]  ;;  %v226_v16 = vld [vmem:[%s552_s3 + $0xd0] sm:$0xff]  ;;  %v209_v17 = vld [vmem:[%s552_s3 + $0x48] sm:$0xff] }
   0xf   :  { %193 = vmatpush.msra.mxu2 %v143_v4  ;;  %252 = vmatpush.msra.mxu0 %v231_v7  ;;  %v225_v18 = vld [vmem:[%s552_s3 + $0xc8] sm:$0xff]  ;;  %v208_v19 = vld [vmem:[%s552_s3 + $0x40] sm:$0xff]  ;;  %v207_v21 = vld [vmem:[%s552_s3 + $0x38] sm:$0xff] }
  0x10   :  { %170 = vmatpush.msrb.mxu1 %v148_v33  ;;  %233 = vmatpush.msra.mxu3 %v214_v6  ;;  %v224_v20 = vld [vmem:[%s552_s3 + $0xc0] sm:$0xff]  ;;  %v222_v24 = vld [vmem:[%s552_s3 + $0xb0] sm:$0xff]  ;;  %v205_v25 = vld [vmem:[%s552_s3 + $0x28] sm:$0xff] }
  0x11   :  { %253 = vmatpush.msra.mxu0 %v230_v9  ;;  %v204_v26 = vld [vmem:[%s552_s3 + $0x20] sm:$0xff]  ;;  %v203_v27 = vld [vmem:[%s552_s3 + $0x18] sm:$0xff]  ;;  %v221_v33 = vld [vmem:[%s552_s3 + $0xa8] sm:$0xff] }
  0x12   :  { %171 = vmatpush.msrb.mxu1 %v146_v35  ;;  %234 = vmatpush.msra.mxu3 %v213_v8  ;;  %v108_v28 = vld [vmem:[%s553_s4] ss:$0 sm:$0xff]  ;;  %v201_v34 = vld [vmem:[%s552_s3 + $0x8] sm:$0xff] }
  0x13   :  { %254 = vmatpush.msra.mxu0 %v229_v10  ;;  %v220_v35 = vld [vmem:[%s552_s3 + $0xa0] sm:$0xff] }
  0x14   :  { %65 = vadd.xlane.f32.xlu1 %v64_v22  ;;  %172 = vmatpush.msrb.mxu1 %v144_v1  ;;  %v223_v22 = vld [vmem:[%s552_s3 + $0xb8] sm:$0xff] }
  0x15   :  { %53 = vadd.xlane.f32.xlu0 %v52_v23  ;;  %235 = vmatpush.msra.mxu3 %v212_v11  ;;  %v206_v23 = vld [vmem:[%s552_s3 + $0x30] sm:$0xff] }
  0x16   :  { %173 = vmatpush.msrb.mxu1 %v142_v3  ;;  %255 = vmatpush.msra.mxu0 %v228_v12 }
  0x17   :  { %236 = vmatpush.msra.mxu3 %v211_v13 }
  0x18   :  { %256 = vmatpush.msra.mxu0 %v227_v14 }
  0x19   :  { %237 = vmatpush.msra.mxu3 %v210_v15 }
  0x1a   :  { %257 = vmatpush.msra.mxu0 %v226_v16 }
  0x1b   :  { %238 = vmatpush.msra.mxu3 %v209_v17 }
  0x1c   :  { %258 = vmatpush.msra.mxu0 %v225_v18 }
  0x1d   :  { %239 = vmatpush.msra.mxu3 %v208_v19 }
  0x1e   :  { %259 = vmatpush.msra.mxu0 %v224_v20 }
  0x1f   :  { %240 = vmatpush.msra.mxu3 %v207_v21 }
  0x20   :  { %260 = vmatpush.msra.mxu0 %v223_v22 }
  0x21   :  { %241 = vmatpush.msra.mxu3 %v206_v23 }
  0x22   :  { %261 = vmatpush.msra.mxu0 %v222_v24 }
  0x23   :  { %242 = vmatpush.msra.mxu3 %v205_v25 }
  0x24   :  { %262 = vmatpush.msra.mxu0 %v221_v33 }
  0x25   :  { %243 = vmatpush.msra.mxu3 %v204_v26 }
  0x26   :  { %263 = vmatpush.msra.mxu0 %v220_v35 }
  0x27   :  { %244 = vmatpush.msra.mxu3 %v203_v27 }
  0x77   :  { %v57_v29 = vpop.xlane.xlu1 %56 }
  0x78   :  { %v45_v31 = vpop.xlane.xlu0 %44  ;;  %v90_v44 = vperm.slane %v57_v29, %v76_v36 }
  0x79   :  { %v51_v32 = vpop.xlane.xlu2 %50  ;;  %v77_v46 = vperm.slane %v45_v31, %v76_v36  ;;  %v200_v36 = vld [vmem:[%s552_s3] sm:$0xff] }
  0x7a   :  { %v83_v51 = vperm.slane %v51_v32, %v82_v42  ;;  %v202_v32 = vld [vmem:[%s552_s3 + $0x10] sm:$0xff] }
  0x7b   :  { %245 = vmatpush.msra.mxu3 %v202_v32 }
  0x7d   :  { %246 = vmatpush.msra.mxu3 %v201_v34 }
  0x7f   :  { %v60_v38 = vpop.xlane.xlu1 %59  ;;  %247 = vmatpush.msra.mxu3 %v200_v36 }
  0x80   :  { %v48_v39 = vpop.xlane.xlu0 %47  ;;  %v91_v40 = vperm.slane %v60_v38, %v78_v37  ;;  %v218_v38 = vld [vmem:[%s552_s3 + $0x90] sm:$0xff] }
  0x81   :  { %v63_v41 = vpop.xlane.xlu2 %62  ;;  %v79_v43 = vperm.slane %v48_v39, %v78_v37  ;;  %v219_v37 = vld [vmem:[%s552_s3 + $0x98] sm:$0xff]  ;;  %v217_v39 = vld [vmem:[%s552_s3 + $0x88] sm:$0xff] }
  0x82   :  { %v93_v47 = vperm.slane %v63_v41, %v82_v42  ;;  %v92_v48 = vsel %vm80_vm1, %v91_v40, %v90_v44  ;;  %264 = vmatpush.msra.mxu0 %v219_v37  ;;  %v216_v40 = vld [vmem:[%s552_s3 + $0x80] sm:$0xff] }
  0x83   :  { %v81_v49 = vsel %vm80_vm1, %v79_v43, %v77_v46  ;;  %v306_v41 = vld [vmem:[%s553_s4 + $0x1] ss:$8 sm:$0x3] }
  0x84   :  { %v94_v54 = vsel %vm84_vm2, %v93_v47, %v92_v48  ;;  %v85_v58 = vsel %vm84_vm2, %v83_v51, %v81_v49  ;;  %265 = vmatpush.msra.mxu0 %v218_v38  ;;  %v151_v42 = vperm.slane %v306_v41, 0  ;;  %v152_v46 = vperm.slane %v306_v41, 1  ;;  %v112_v51 = vld [vmem:[%s553_s4] sm:$0x18] }
  0x86   :  { %266 = vmatpush.msra.mxu0 %v217_v39 }
  0x87   :  { %v66_v50 = vpop.xlane.xlu1 %65 }
  0x88   :  { %v95_v52 = vperm.slane %v66_v50, %v86_v45  ;;  %v54_v53 = vpop.xlane.xlu0 %53  ;;  %267 = vmatpush.msra.mxu0 %v216_v40  ;;  %v111_v50 = vld [vmem:[%s553_s4 + $0x2] ss:$0 sm:$0xff] }
  0x89   :  { %v87_v55 = vperm.slane %v54_v53, %v86_v45 }
  0x8a   :  { %v96_v56 = vsel %vm88_vm3, %v95_v52, %v94_v54  ;;  %v273_v54 = vrot.slane %v112_v51, 3 }
  0x8b   :  { %v89_v59 = vsel %vm88_vm3, %v87_v55, %v85_v58 }
  0x8c   :  { %v98_v60 = vsel %vm97_vm4, %v96_v56, %v89_v59 }
  0x8d   :  { %v100_v61 = vadd.f32 %v98_v60, %v26_v57 }
  0x8f   :  { %102 = vst.msk [vmem:[#allocation2] sm:$0x3] %vm24_vm0, %v100_v61 }
  0x96   :  { %v106_v62 = vld [vmem:[#allocation2] sm:$0x3] }
  0x97   :  { %v107_v63 = vmul.f32 0.00390625, %v106_v62 }
  0x99   :  { %307 = vmatmul.msk.f32.vlgmr.msra.gmra.mxu1 %vm117_vm5, %v107_v63 }
 0x116   :  { %v138_v29 = vpop.f32.mrf.mxu1 }
 0x117   :  { %v139_v30 = vadd.f32 %v138_v29, %v108_v28 }
 0x119   :  { %v141_v31 = vmax.f32 %v139_v30, 0.0 }
 0x11b   :  { %308 = vmatmul.msk.f32.vlgmr.msrb.gmra.mxu1 %vm117_vm5, %v141_v31  ;;  %309 = vmatmul.msk.f32.vlgmr.msra.gmra.mxu2 %vm117_vm5, %v141_v31 }
 0x198   :  { %v175_v43 = vpop.f32.mrf.mxu1 }
 0x199   :  { %v176_v44 = vadd.f32 %v175_v43, %v151_v42 }
 0x19b   :  { %v198_v45 = vmax.f32 %v176_v44, 0.0 }
 0x19d   :  { %248 = vmatmul.f32.vlgmr.msra.gmra.mxu3 %v198_v45 }
 0x19e   :  { %v195_v47 = vpop.f32.mrf.mxu2 }
 0x19f   :  { %v196_v48 = vadd.f32 %v195_v47, %v152_v46 }
 0x1a1   :  { %v199_v49 = vmax.f32 %v196_v48, 0.0 }
 0x1a3   :  { %268 = vmatmul.f32.vlgmr.msra.gmra.mxu0 %v199_v49 }
 0x220   :  { %v249_v52 = vpop.f32.mrf.mxu3  ;;  %v269_v55 = vpop.f32.mrf.mxu0 }
 0x221   :  { %v250_v53 = vadd.f32 %v249_v52, %v111_v50 }
 0x223   :  { %v270_v56 = vadd.f32 %v269_v55, %v250_v53 }
 0x225   :  { %v275_v57 = vadd.f32 %v273_v54, %v270_v56 }
 0x227   :  { %v277_v58 = vsel %vm276_vm6, %v275_v57, -inf }
 0x228   :  { %278 = vmax.xlane.f32.xlu2 %v277_v58 }
 0x29b   :  { %v279_v59 = vpop.xlane.xlu2 %278 }
 0x29c   :  { %v280_v60 = vsub.f32 %v275_v57, %v279_v59 }
 0x29e   :  { %v281_v61 = vmul.f32 1.442695, %v280_v60 }
 0x2a0   :  { %311 = vpow2.f32 %v281_v61 }
 0x2a6   :  { %v312_v62 = vpop.eup %311 }
 0x2a7   :  { %v283_v63 = vsel %vm276_vm6, %v312_v62, 0.0 }
 0x2a8   :  { %284 = vadd.xlane.f32.xlu0 %v283_v63 }
 0x31b   :  { %v285_v0 = vpop.xlane.xlu0 %284 }
 0x31c   :  { %313 = vrcp.f32 %v285_v0  ;;  %v297_v4 = vand.u32 2147483648, %v285_v0  ;;  %v295_v6 = vand.u32 2147483647, %v285_v0  ;;  %vm291_vm8 = vweird.f32 %v285_v0 }
 0x31e   :  { %v298_v8 = vor.u32 1.1754944e-38, %v297_v4  ;;  %vm296_vm10 = vcmp.eq.f32.partialorder %v295_v6, 8.507059e+37 }
 0x322   :  { %v314_v1 = vpop.eup %313 }
 0x323   :  { %v287_v2 = vmul.f32 %v314_v1, %v285_v0  ;;  %vm292_vm7 = vweird.f32 %v314_v1 }
 0x324   :  { %vm293_vm9 = vmor %vm291_vm8, %vm292_vm7 }
 0x325   :  { %v288_v3 = vsub.f32 1.0, %v287_v2 }
 0x327   :  { %v289_v5 = vmul.f32 %v314_v1, %v288_v3 }
 0x329   :  { %v290_v7 = vadd.f32 %v314_v1, %v289_v5 }
 0x32b   :  { %v294_v9 = vsel %vm293_vm9, %v314_v1, %v290_v7 }
 0x32c   :  { %v299_v10 = vsel %vm296_vm10, %v298_v8, %v294_v9 }
 0x32d   :  { %v300_v11 = vmul.f32 %v312_v62, %v299_v10 }
 0x32f   :  { %301 = vst.msk [vmem:[%s554_s5] sm:$0x3] %vm276_vm6, %v300_v11 }

</bundles_post_ra>
